<compile_context>
chip_gen: v7x
topology: tpu7x:2x2x1
jax: 0.10.0
libtpu: 0.0.40
codegen_flags: <defaults>
</compile_context>

<pallas_src>
import functools

import jax
import jax.numpy as jnp
from jax.experimental import pallas as pl
from jax.experimental.pallas import tpu as pltpu

K_IN = 100          # logical input features
K_PAD = 128         # padded contraction dim for layer 1 (zeros are inert)
HID = 256
N_OUT = 784         # output features (28*28); also the full last dim of the output


def _round_up(x, m):
    return ((x + m - 1) // m) * m


def _choose_tm(B, tm_max):
    """Pick a batch tile that is a multiple of 8, minimizes batch padding,
    and yields >= 2 grid steps when possible (keeps both v7x cores busy)."""
    B8 = max(8, _round_up(B, 8))
    if B8 <= 8:
        return 8
    if B8 <= 2 * tm_max:
        # Two (nearly) balanced tiles; padding is at most 8 rows.
        return min(tm_max, _round_up((B8 + 1) // 2, 8))
    best_tm, best_pad = tm_max, _round_up(B8, tm_max) - B8
    for cand in (384, 256, 128):
        if cand >= tm_max:
            continue
        pad = _round_up(B8, cand) - B8
        if pad < best_pad:
            best_tm, best_pad = cand, pad
    return best_tm


def _generator_kernel(z_ref, w1_ref, b1_ref, w2_ref, b2_ref, w3_ref, b3_ref, o_ref):
    # One batch tile per grid step; weights/biases are VMEM-resident.
    # Matmuls run bf16 x bf16 -> f32 on the MXU; elementwise math stays f32.
    x = z_ref[...]                                               # (TM, 128) bf16

    h1 = jnp.dot(x, w1_ref[...], preferred_element_type=jnp.float32) + b1_ref[...]
    h1 = jnp.maximum(h1, 0.0)                                    # (TM, 256) f32

    h2 = jnp.dot(h1.astype(jnp.bfloat16), w2_ref[...],
                 preferred_element_type=jnp.float32) + b2_ref[...]
    h2 = jnp.maximum(h2, 0.0)                                    # (TM, 256) f32

    logits = jnp.dot(h2.astype(jnp.bfloat16), w3_ref[...],
                     preferred_element_type=jnp.float32) + b3_ref[...]  # (TM, 784) f32

    # sigmoid(x) = 1 / (1 + exp(-x)); exp and approx-reciprocal both hit the EUP.
    sig = pl.reciprocal(1.0 + jnp.exp(-logits), approx=True)
    o_ref[...] = sig.astype(o_ref.dtype)                         # bf16 store


def prepare_params(params):
    """Cast weights to bf16 and pad to lane-dense shapes.  Do this ONCE per
    parameter set, not per forward call."""
    w1, b1, w2, b2, w3, b3 = params
    w1p = jnp.zeros((K_PAD, HID), jnp.bfloat16).at[:K_IN, :].set(w1.astype(jnp.bfloat16))
    w2p = w2.astype(jnp.bfloat16)
    w3p = w3.astype(jnp.bfloat16)
    b1p = b1.reshape(1, HID).astype(jnp.float32)
    b2p = b2.reshape(1, HID).astype(jnp.float32)
    b3p = b3.reshape(1, N_OUT).astype(jnp.float32)
    return (w1p, b1p, w2p, b2p, w3p, b3p)


@functools.partial(jax.jit, static_argnames=("tm",))
def generator_forward(z, prepped_params, *, tm=512):
    """z: (B, 100) float32 -> (B, 1, 28, 28) bfloat16 (sigmoid outputs)."""
    w1, b1, w2, b2, w3, b3 = prepped_params
    B = z.shape[0]

    TM = _choose_tm(B, tm)
    B_pad = _round_up(max(B, 8), TM)

    # Pad batch to a multiple of TM, pad K to 128, cast to bf16 in one pass.
    zp = jnp.zeros((B_pad, K_PAD), jnp.bfloat16).at[:B, :K_IN].set(z.astype(jnp.bfloat16))

    grid = (B_pad // TM,)
    resident = lambda i: (0, 0)   # same block every step -> stays in VMEM

    weight_bytes = (K_PAD * HID + HID * HID + HID * N_OUT) * 2 + (HID + HID + N_OUT) * 4
    cost = pl.CostEstimate(
        flops=2 * B_pad * (K_PAD * HID + HID * HID + HID * N_OUT),
        transcendentals=2 * B_pad * N_OUT,
        bytes_accessed=B_pad * K_PAD * 2 + B_pad * N_OUT * 2 + weight_bytes,
    )

    out = pl.pallas_call(
        _generator_kernel,
        out_shape=jax.ShapeDtypeStruct((B_pad, N_OUT), jnp.bfloat16),
        grid=grid,
        in_specs=[
            pl.BlockSpec((TM, K_PAD), lambda i: (i, 0)),     # z tile (pipelined)
            pl.BlockSpec((K_PAD, HID), resident),            # w1
            pl.BlockSpec((1, HID), resident),                # b1
            pl.BlockSpec((HID, HID), resident),              # w2
            pl.BlockSpec((1, HID), resident),                # b2
            pl.BlockSpec((HID, N_OUT), resident),            # w3 (last dim = full dim)
            pl.BlockSpec((1, N_OUT), resident),              # b3
        ],
        out_specs=pl.BlockSpec((TM, N_OUT), lambda i: (i, 0)),
        compiler_params=pltpu.CompilerParams(
            dimension_semantics=("parallel",),               # v7x: shard batch over 2 TCs
            vmem_limit_bytes=32 << 20,                       # safe on v5e's 16 MiB default
        ),
        cost_estimate=cost,
    )(zp, w1, b1, w2, b2, w3, b3)

    if B_pad != B:
        out = out[:B]
    # The `view(-1, 1, 28, 28)` equivalent.
    return out.reshape(-1, 1, 28, 28)


def init_params(key):
    """Deterministic synthetic parameters matching the nn.Linear shapes.
    Stored as (in, out) f32, i.e. PyTorch W.T."""
    k1, k2, k3, k4, k5, k6 = jax.random.split(key, 6)
    w1 = jax.random.normal(k1, (K_IN, HID), jnp.float32) * (1.0 / jnp.sqrt(100.0))
    b1 = jax.random.normal(k2, (1, HID), jnp.float32) * 0.01
    w2 = jax.random.normal(k3, (HID, HID), jnp.float32) * (1.0 / jnp.sqrt(256.0))
    b2 = jax.random.normal(k4, (1, HID), jnp.float32) * 0.01
    w3 = jax.random.normal(k5, (HID, N_OUT), jnp.float32) * (1.0 / jnp.sqrt(256.0))
    b3 = jax.random.normal(k6, (1, N_OUT), jnp.float32) * 0.01
    return (w1, b1, w2, b2, w3, b3)


def reference_forward(z, params):
    """Pure-JAX f32 reference (faithful to the PyTorch module)."""
    w1, b1, w2, b2, w3, b3 = params
    h1 = jnp.maximum(z @ w1 + b1, 0.0)
    h2 = jnp.maximum(h1 @ w2 + b2, 0.0)
    out = jax.nn.sigmoid(h2 @ w3 + b3)
    return out.reshape(-1, 1, 28, 28)


if __name__ == "__main__":
    key = jax.random.PRNGKey(0)
    kz, kp = jax.random.split(key)

    B = 8  # small batch for the correctness run
    z = jax.random.normal(kz, (B, K_IN), jnp.float32)
    params = init_params(kp)
    prepped = prepare_params(params)

    out = generator_forward(z, prepped)
    out = jax.block_until_ready(out)

    assert out.shape == (B, 1, 28, 28), out.shape

    # bf16 matmuls + bf16 output store + approx reciprocal vs f32 reference:
    # sigmoid outputs live in (0,1); a 3e-2 absolute tolerance comfortably
    # covers the quantization of three stacked bf16 matmuls plus the bf16 store.
    ref = reference_forward(z, params)
    err = float(jnp.max(jnp.abs(out.astype(jnp.float32) - ref)))
    assert err < 3e-2, err

    print("KERNEL_OK")
</pallas_src>

<mosaic_0001>
module attributes {stable_mosaic.version = 11 : i64} {
  func.func @_generator_kernel(%arg0: i32, %arg1: memref<8x128xbf16, #tpu.memory_space<vmem>>, %arg2: memref<128x256xbf16, #tpu.memory_space<vmem>>, %arg3: memref<1x256xf32, #tpu.memory_space<vmem>>, %arg4: memref<256x256xbf16, #tpu.memory_space<vmem>>, %arg5: memref<1x256xf32, #tpu.memory_space<vmem>>, %arg6: memref<256x784xbf16, #tpu.memory_space<vmem>>, %arg7: memref<1x784xf32, #tpu.memory_space<vmem>>, %arg8: memref<8x784xbf16, #tpu.memory_space<vmem>>) attributes {dimension_semantics = [#tpu.dimension_semantics<parallel>], iteration_bounds = array<i64: 1>, scalar_prefetch = 0 : i64, scratch_operands = 0 : i64, tpu.core_type = #tpu.core_type<tc>, window_params = [{transform_indices = @transform_0, window_bounds = array<i64: 8, 128>}, {pipeline_mode = #tpu.pipeline_mode<synchronous>, transform_indices = @transform_1, window_bounds = array<i64: 128, 256>}, {pipeline_mode = #tpu.pipeline_mode<synchronous>, transform_indices = @transform_2, window_bounds = array<i64: 1, 256>}, {pipeline_mode = #tpu.pipeline_mode<synchronous>, transform_indices = @transform_3, window_bounds = array<i64: 256, 256>}, {pipeline_mode = #tpu.pipeline_mode<synchronous>, transform_indices = @transform_4, window_bounds = array<i64: 1, 256>}, {pipeline_mode = #tpu.pipeline_mode<synchronous>, transform_indices = @transform_5, window_bounds = array<i64: 256, 784>}, {pipeline_mode = #tpu.pipeline_mode<synchronous>, transform_indices = @transform_6, window_bounds = array<i64: 1, 784>}, {transform_indices = @transform_7, window_bounds = array<i64: 8, 784>}]} {
    %c0 = arith.constant 0 : index
    %c0_0 = arith.constant 0 : index
    %0 = vector.load %arg1[%c0, %c0_0] : memref<8x128xbf16, #tpu.memory_space<vmem>>, vector<8x128xbf16>
    %c0_1 = arith.constant 0 : index
    %c0_2 = arith.constant 0 : index
    %1 = vector.load %arg2[%c0_1, %c0_2] : memref<128x256xbf16, #tpu.memory_space<vmem>>, vector<128x256xbf16>
    %cst = arith.constant dense<0.000000e+00> : vector<8x256xf32>
    %2 = tpu.matmul %0, %1, %cst {dimension_numbers = #tpu.dot_dimension_numbers<[1], [0], [0], [1], [0, 0, 1, 1], [], []>} : vector<8x128xbf16>, vector<128x256xbf16>, vector<8x256xf32> -> vector<8x256xf32>
    %c0_3 = arith.constant 0 : index
    %c0_4 = arith.constant 0 : index
    %3 = vector.load %arg3[%c0_3, %c0_4] : memref<1x256xf32, #tpu.memory_space<vmem>>, vector<1x256xf32>
    %4 = vector.broadcast %3 : vector<1x256xf32> to vector<8x256xf32>
    %5 = arith.addf %2, %4 : vector<8x256xf32>
    %cst_5 = arith.constant 0.000000e+00 : f32
    %6 = vector.broadcast %cst_5 : f32 to vector<8x256xf32>
    %7 = arith.maximumf %5, %6 : vector<8x256xf32>
    %8 = arith.truncf %7 : vector<8x256xf32> to vector<8x256xbf16>
    %c0_6 = arith.constant 0 : index
    %c0_7 = arith.constant 0 : index
    %9 = vector.load %arg4[%c0_6, %c0_7] : memref<256x256xbf16, #tpu.memory_space<vmem>>, vector<256x256xbf16>
    %cst_8 = arith.constant dense<0.000000e+00> : vector<8x256xf32>
    %10 = tpu.matmul %8, %9, %cst_8 {dimension_numbers = #tpu.dot_dimension_numbers<[1], [0], [0], [1], [0, 0, 1, 1], [], []>} : vector<8x256xbf16>, vector<256x256xbf16>, vector<8x256xf32> -> vector<8x256xf32>
    %c0_9 = arith.constant 0 : index
    %c0_10 = arith.constant 0 : index
    %11 = vector.load %arg5[%c0_9, %c0_10] : memref<1x256xf32, #tpu.memory_space<vmem>>, vector<1x256xf32>
    %12 = vector.broadcast %11 : vector<1x256xf32> to vector<8x256xf32>
    %13 = arith.addf %10, %12 : vector<8x256xf32>
    %cst_11 = arith.constant 0.000000e+00 : f32
    %14 = vector.broadcast %cst_11 : f32 to vector<8x256xf32>
    %15 = arith.maximumf %13, %14 : vector<8x256xf32>
    %16 = arith.truncf %15 : vector<8x256xf32> to vector<8x256xbf16>
    %c0_12 = arith.constant 0 : index
    %c0_13 = arith.constant 0 : index
    %17 = vector.load %arg6[%c0_12, %c0_13] : memref<256x784xbf16, #tpu.memory_space<vmem>>, vector<256x784xbf16>
    %cst_14 = arith.constant dense<0.000000e+00> : vector<8x784xf32>
    %18 = tpu.matmul %16, %17, %cst_14 {dimension_numbers = #tpu.dot_dimension_numbers<[1], [0], [0], [1], [0, 0, 1, 1], [], []>} : vector<8x256xbf16>, vector<256x784xbf16>, vector<8x784xf32> -> vector<8x784xf32>
    %c0_15 = arith.constant 0 : index
    %c0_16 = arith.constant 0 : index
    %19 = vector.load %arg7[%c0_15, %c0_16] : memref<1x784xf32, #tpu.memory_space<vmem>>, vector<1x784xf32>
    %20 = vector.broadcast %19 : vector<1x784xf32> to vector<8x784xf32>
    %21 = arith.addf %18, %20 : vector<8x784xf32>
    %cst_17 = arith.constant 0.000000e+00 : f32
    %22 = vector.broadcast %cst_17 : f32 to vector<8x784xf32>
    %23 = arith.subf %22, %21 : vector<8x784xf32>
    %24 = math.exp %23 : vector<8x784xf32>
    %cst_18 = arith.constant 1.000000e+00 : f32
    %25 = vector.broadcast %cst_18 : f32 to vector<8x784xf32>
    %26 = arith.addf %25, %24 : vector<8x784xf32>
    %27 = tpu.reciprocal %26 {approx = true} : vector<8x784xf32> -> vector<8x784xf32>
    %28 = arith.truncf %27 : vector<8x784xf32> to vector<8x784xbf16>
    %c0_19 = arith.constant 0 : index
    %c0_20 = arith.constant 0 : index
    %29 = vector.load %arg8[%c0_19, %c0_20] : memref<8x784xbf16, #tpu.memory_space<vmem>>, vector<8x784xbf16>
    tpu.vector_store %arg8[%c0_19, %c0_20], %28 {strides = array<i32>} : memref<8x784xbf16, #tpu.memory_space<vmem>>, vector<8x784xbf16>,
    return
  }
  func.func @transform_0(%arg0: i32) -> (i32, i32) {
    %c0_i32 = arith.constant 0 : i32
    %c0_i32_0 = arith.constant 0 : i32
    return %arg0, %c0_i32 : i32, i32
  }
  func.func @transform_1(%arg0: i32) -> (i32, i32) {
    %c0_i32 = arith.constant 0 : i32
    %c0_i32_0 = arith.constant 0 : i32
    %c0_i32_1 = arith.constant 0 : i32
    return %c0_i32, %c0_i32_0 : i32, i32
  }
  func.func @transform_2(%arg0: i32) -> (i32, i32) {
    %c0_i32 = arith.constant 0 : i32
    %c0_i32_0 = arith.constant 0 : i32
    %c0_i32_1 = arith.constant 0 : i32
    return %c0_i32, %c0_i32_0 : i32, i32
  }
  func.func @transform_3(%arg0: i32) -> (i32, i32) {
    %c0_i32 = arith.constant 0 : i32
    %c0_i32_0 = arith.constant 0 : i32
    %c0_i32_1 = arith.constant 0 : i32
    return %c0_i32, %c0_i32_0 : i32, i32
  }
  func.func @transform_4(%arg0: i32) -> (i32, i32) {
    %c0_i32 = arith.constant 0 : i32
    %c0_i32_0 = arith.constant 0 : i32
    %c0_i32_1 = arith.constant 0 : i32
    return %c0_i32, %c0_i32_0 : i32, i32
  }
  func.func @transform_5(%arg0: i32) -> (i32, i32) {
    %c0_i32 = arith.constant 0 : i32
    %c0_i32_0 = arith.constant 0 : i32
    %c0_i32_1 = arith.constant 0 : i32
    return %c0_i32, %c0_i32_0 : i32, i32
  }
  func.func @transform_6(%arg0: i32) -> (i32, i32) {
    %c0_i32 = arith.constant 0 : i32
    %c0_i32_0 = arith.constant 0 : i32
    %c0_i32_1 = arith.constant 0 : i32
    return %c0_i32, %c0_i32_0 : i32, i32
  }
  func.func @transform_7(%arg0: i32) -> (i32, i32) {
    %c0_i32 = arith.constant 0 : i32
    %c0_i32_0 = arith.constant 0 : i32
    return %arg0, %c0_i32 : i32, i32
  }
}

</mosaic_0001>

<bundles_post_ra>
// kernel: generator_forward.1
= control target key start
LH: loop header
LB: loop body
LE: loop exit
PB: predicated region body
PF: predicated region fallthrough
CT: control target
= control target key end

     0   :  { %v1858_v1 = vmov 0   ;;  %vm1401_vm0 = vcmask 125952   ;;  %s2437_s1 = inlined_call_operand.vmem [shape: bf16[128,256], index: 1, kind: input, shape index: {}]   ;;  %s2438_s3 = inlined_call_operand.vmem [shape: bf16[256,256], index: 3, kind: input, shape index: {}]   ;;  %s2439_s0 = inlined_call_operand.vmem [shape: bf16[8,128], index: 0, kind: input, shape index: {}]   ;;  %s2440_s5 = inlined_call_operand.vmem [shape: bf16[256,784], index: 5, kind: input, shape index: {}]   ;;  %s2441_s2 = inlined_call_operand.vmem [shape: f32[1,256], index: 2, kind: input, shape index: {}]   ;;  %s2442_s4 = inlined_call_operand.vmem [shape: f32[1,256], index: 4, kind: input, shape index: {}]   ;;  %s2443_s6 = inlined_call_operand.vmem [shape: f32[1,784], index: 6, kind: input, shape index: {}]   ;;  %s2444_s7 = inlined_call_operand.vmem [shape: bf16[8,784], index: 7, kind: output, shape index: {}]  }
   0x1   :  { %v1598_v0 = vld [vmem:[%s2437_s1 + $0x4] ss:$8 sps:$4 sm:$0xff]   ;;  %168 = vmatprep.mubr.bf16.mxu0 %v1858_v1  ;;  %v1600_v2 = vld [vmem:[%s2437_s1] ss:$8 sps:$4 sm:$0xff]   ;;  %v1601_v3 = vld [vmem:[%s2437_s1 + $0x14] ss:$8 sps:$4 sm:$0xff]  }
   0x2   :  { %136 = vmatprep.subr.bf16.mxu0 %v1598_v0  ;;  %v1603_v4 = vld [vmem:[%s2437_s1 + $0x10] ss:$8 sps:$4 sm:$0xff]   ;;  %v1604_v5 = vld [vmem:[%s2437_s1 + $0x24] ss:$8 sps:$4 sm:$0xff]   ;;  %v1606_v6 = vld [vmem:[%s2437_s1 + $0x20] ss:$8 sps:$4 sm:$0xff]  }
   0x3   :  { %137 = vmatpush1.bf16.msra.mxu0 %v1600_v2  ;;  %v1607_v7 = vld [vmem:[%s2437_s1 + $0x34] ss:$8 sps:$4 sm:$0xff]   ;;  %v1609_v8 = vld [vmem:[%s2437_s1 + $0x30] ss:$8 sps:$4 sm:$0xff]   ;;  %v1610_v9 = vld [vmem:[%s2437_s1 + $0x44] ss:$8 sps:$4 sm:$0xff]  }
   0x4   :  { %138 = vmatprep.subr.bf16.mxu0 %v1601_v3  ;;  %v1622_v10 = vld [vmem:[%s2438_s3 + $0x4] ss:$8 sps:$4 sm:$0xff]   ;;  %v1624_v11 = vld [vmem:[%s2438_s3] ss:$8 sps:$4 sm:$0xff]   ;;  %v1625_v12 = vld [vmem:[%s2438_s3 + $0x14] ss:$8 sps:$4 sm:$0xff]  }
   0x5   :  { %385 = vmatprep.subr.bf16.mxu1 %v1622_v10  ;;  %v1612_v13 = vld [vmem:[%s2437_s1 + $0x40] ss:$8 sps:$4 sm:$0xff]   ;;  %v1627_v14 = vld [vmem:[%s2438_s3 + $0x10] ss:$8 sps:$4 sm:$0xff]   ;;  %v1628_v15 = vld [vmem:[%s2438_s3 + $0x24] ss:$8 sps:$4 sm:$0xff]  }
   0x6   :  { %386 = vmatpush1.bf16.msra.mxu1 %v1624_v11  ;;  %v1613_v16 = vld [vmem:[%s2437_s1 + $0x54] ss:$8 sps:$4 sm:$0xff]   ;;  %v1615_v17 = vld [vmem:[%s2437_s1 + $0x50] ss:$8 sps:$4 sm:$0xff]   ;;  %v1630_v18 = vld [vmem:[%s2438_s3 + $0x20] ss:$8 sps:$4 sm:$0xff]  }
   0x7   :  { %139 = vmatpush1.bf16.msra.mxu0 %v1603_v4  ;;  %387 = vmatprep.subr.bf16.mxu1 %v1625_v12  ;;  %v1631_v19 = vld [vmem:[%s2438_s3 + $0x34] ss:$8 sps:$4 sm:$0xff]   ;;  %v1616_v20 = vld [vmem:[%s2437_s1 + $0x64] ss:$8 sps:$4 sm:$0xff]   ;;  %v1618_v21 = vld [vmem:[%s2437_s1 + $0x60] ss:$8 sps:$4 sm:$0xff]  }
   0x8   :  { %140 = vmatprep.subr.bf16.mxu0 %v1604_v5  ;;  %v1633_v22 = vld [vmem:[%s2438_s3 + $0x30] ss:$8 sps:$4 sm:$0xff]   ;;  %v1634_v23 = vld [vmem:[%s2438_s3 + $0x44] ss:$8 sps:$4 sm:$0xff]   ;;  %v1619_v24 = vld [vmem:[%s2437_s1 + $0x74] ss:$8 sps:$4 sm:$0xff]  }
   0x9   :  { %v1621_v25 = vld [vmem:[%s2437_s1 + $0x70] ss:$8 sps:$4 sm:$0xff]   ;;  %v1636_v26 = vld [vmem:[%s2438_s3 + $0x40] ss:$8 sps:$4 sm:$0xff]   ;;  %v1637_v27 = vld [vmem:[%s2438_s3 + $0x54] ss:$8 sps:$4 sm:$0xff]  }
   0xa   :  { %388 = vmatpush1.bf16.msra.mxu1 %v1627_v14  ;;  %v1639_v28 = vld [vmem:[%s2438_s3 + $0x50] ss:$8 sps:$4 sm:$0xff]   ;;  %v27_v29 = vld [vmem:[%s2439_s0] sm:$0xf]  ;;  %v1640_v30 = vld [vmem:[%s2438_s3 + $0x64] ss:$8 sps:$4 sm:$0xff]  }
   0xb   :  { %141 = vmatpush1.bf16.msra.mxu0 %v1606_v6  ;;  %389 = vmatprep.subr.bf16.mxu1 %v1628_v15  ;;  %v1642_v31 = vld [vmem:[%s2438_s3 + $0x60] ss:$8 sps:$4 sm:$0xff]   ;;  %v1643_v32 = vld [vmem:[%s2438_s3 + $0x74] ss:$8 sps:$4 sm:$0xff]   ;;  %v1645_v33 = vld [vmem:[%s2438_s3 + $0x70] ss:$8 sps:$4 sm:$0xff]   ;;  %v46_v15 = vlaneseq }
   0xc   :  { %142 = vmatprep.subr.bf16.mxu0 %v1607_v7  ;;  %v1646_v34 = vld [vmem:[%s2438_s3 + $0x84] ss:$8 sps:$4 sm:$0xff]   ;;  %v1648_v35 = vld [vmem:[%s2438_s3 + $0x80] ss:$8 sps:$4 sm:$0xff]   ;;  %v1649_v36 = vld [vmem:[%s2438_s3 + $0x94] ss:$8 sps:$4 sm:$0xff]  }
   0xd   :  { %v1651_v37 = vld [vmem:[%s2438_s3 + $0x90] ss:$8 sps:$4 sm:$0xff]   ;;  %v1652_v38 = vld [vmem:[%s2438_s3 + $0xa4] ss:$8 sps:$4 sm:$0xff]   ;;  %v1654_v39 = vld [vmem:[%s2438_s3 + $0xa0] ss:$8 sps:$4 sm:$0xff]  }
   0xe   :  { %390 = vmatpush1.bf16.msra.mxu1 %v1630_v18  ;;  %v1655_v40 = vld [vmem:[%s2438_s3 + $0xb4] ss:$8 sps:$4 sm:$0xff]   ;;  %v1657_v41 = vld [vmem:[%s2438_s3 + $0xb0] ss:$8 sps:$4 sm:$0xff]   ;;  %v1658_v42 = vld [vmem:[%s2438_s3 + $0xc4] ss:$8 sps:$4 sm:$0xff]  }
   0xf   :  { %143 = vmatpush1.bf16.msra.mxu0 %v1609_v8  ;;  %391 = vmatprep.subr.bf16.mxu1 %v1631_v19  ;;  %v1660_v43 = vld [vmem:[%s2438_s3 + $0xc0] ss:$8 sps:$4 sm:$0xff]   ;;  %v1661_v44 = vld [vmem:[%s2438_s3 + $0xd4] ss:$8 sps:$4 sm:$0xff]   ;;  %v1663_v45 = vld [vmem:[%s2438_s3 + $0xd0] ss:$8 sps:$4 sm:$0xff]  }
  0x10   :  { %144 = vmatprep.subr.bf16.mxu0 %v1610_v9  ;;  %v1664_v46 = vld [vmem:[%s2438_s3 + $0xe4] ss:$8 sps:$4 sm:$0xff]   ;;  %v1666_v47 = vld [vmem:[%s2438_s3 + $0xe0] ss:$8 sps:$4 sm:$0xff]   ;;  %v1667_v48 = vld [vmem:[%s2438_s3 + $0xf4] ss:$8 sps:$4 sm:$0xff]  }
  0x11   :  { %v1669_v49 = vld [vmem:[%s2438_s3 + $0xf0] ss:$8 sps:$4 sm:$0xff]   ;;  %v1670_v50 = vld [vmem:[%s2440_s5] ss:$28 sps:$4 sm:$0xff]   ;;  %v1675_v52 = vld [vmem:[%s2440_s5 + $0xc] ss:$28 sps:$4 sm:$0xff]  }
  0x12   :  { %392 = vmatpush1.bf16.msra.mxu1 %v1633_v22  ;;  %v1672_v51 = vld [vmem:[%s2440_s5 + $0x4] ss:$28 sps:$4 sm:$0xff]   ;;  %v1678_v53 = vld [vmem:[%s2440_s5 + $0x3c] ss:$28 sps:$4 sm:$0xff]   ;;  %v1684_v55 = vld [vmem:[%s2440_s5 + $0x74] ss:$28 sps:$4 sm:$0xff]  }
  0x13   :  { %145 = vmatpush1.bf16.msra.mxu0 %v1612_v13  ;;  %393 = vmatprep.subr.bf16.mxu1 %v1634_v23  ;;  %v1676_v54 = vld [vmem:[%s2440_s5 + $0x38] ss:$28 sps:$4 sm:$0xff]   ;;  %v1682_v56 = vld [vmem:[%s2440_s5 + $0x70] ss:$28 sps:$4 sm:$0xff]   ;;  %v1688_v58 = vld [vmem:[%s2440_s5 + $0xa8] ss:$28 sps:$4 sm:$0xff]  }
  0x14   :  { %146 = vmatprep.subr.bf16.mxu0 %v1613_v16  ;;  %v1690_v57 = vld [vmem:[%s2440_s5 + $0xac] ss:$28 sps:$4 sm:$0xff]   ;;  %v1696_v59 = vld [vmem:[%s2440_s5 + $0xe4] ss:$28 sps:$4 sm:$0xff]   ;;  %v1702_v61 = vld [vmem:[%s2440_s5 + $0x11c] ss:$28 sps:$4 sm:$0xff]  }
  0x15   :  { %v1694_v60 = vld [vmem:[%s2440_s5 + $0xe0] ss:$28 sps:$4 sm:$0xff]   ;;  %v1700_v62 = vld [vmem:[%s2440_s5 + $0x118] ss:$28 sps:$4 sm:$0xff]   ;;  %v1706_v0 = vld [vmem:[%s2440_s5 + $0x150] ss:$28 sps:$4 sm:$0xff]  }
  0x16   :  { %394 = vmatpush1.bf16.msra.mxu1 %v1636_v26  ;;  %v1708_v63 = vld [vmem:[%s2440_s5 + $0x154] ss:$28 sps:$4 sm:$0xff]   ;;  %v1714_v1 = vld [vmem:[%s2440_s5 + $0x18c] ss:$28 sps:$4 sm:$0xff]   ;;  %v1720_v3 = vld [vmem:[%s2440_s5 + $0x1c4] ss:$28 sps:$4 sm:$0xff]  }
  0x17   :  { %147 = vmatpush1.bf16.msra.mxu0 %v1615_v17  ;;  %395 = vmatprep.subr.bf16.mxu1 %v1637_v27  ;;  %v1712_v2 = vld [vmem:[%s2440_s5 + $0x188] ss:$28 sps:$4 sm:$0xff]   ;;  %v1718_v4 = vld [vmem:[%s2440_s5 + $0x1c0] ss:$28 sps:$4 sm:$0xff]   ;;  %v1724_v6 = vld [vmem:[%s2440_s5 + $0x1f8] ss:$28 sps:$4 sm:$0xff]  }
  0x18   :  { %148 = vmatprep.subr.bf16.mxu0 %v1616_v20  ;;  %v1726_v5 = vld [vmem:[%s2440_s5 + $0x1fc] ss:$28 sps:$4 sm:$0xff]   ;;  %v1732_v7 = vld [vmem:[%s2440_s5 + $0x234] ss:$28 sps:$4 sm:$0xff]   ;;  %v1738_v9 = vld [vmem:[%s2440_s5 + $0x26c] ss:$28 sps:$4 sm:$0xff]  }
  0x19   :  { %v1730_v8 = vld [vmem:[%s2440_s5 + $0x230] ss:$28 sps:$4 sm:$0xff]   ;;  %v1736_v10 = vld [vmem:[%s2440_s5 + $0x268] ss:$28 sps:$4 sm:$0xff]   ;;  %v1742_v12 = vld [vmem:[%s2440_s5 + $0x2a0] ss:$28 sps:$4 sm:$0xff]  }
  0x1a   :  { %396 = vmatpush1.bf16.msra.mxu1 %v1639_v28  ;;  %v1744_v11 = vld [vmem:[%s2440_s5 + $0x2a4] ss:$28 sps:$4 sm:$0xff]   ;;  %v1750_v13 = vld [vmem:[%s2440_s5 + $0x2dc] ss:$28 sps:$4 sm:$0xff]   ;;  %v2133_v16 = vshrl.u32 %v46_v15, 7 }
  0x1b   :  { %149 = vmatpush1.bf16.msra.mxu0 %v1618_v21  ;;  %397 = vmatprep.subr.bf16.mxu1 %v1640_v30  ;;  %v1748_v14 = vld [vmem:[%s2440_s5 + $0x2d8] ss:$28 sps:$4 sm:$0xff]   ;;  %v44_v18 = vld [vmem:[%s2441_s2] sm:$0x3] }
  0x1c   :  { %150 = vmatprep.subr.bf16.mxu0 %v1619_v24  ;;  %v2136_v17 = vsub.s32 0, %v2133_v16  ;;  %v2142_v19 = vsub.s32 1, %v2133_v16 }
  0x1e   :  { %398 = vmatpush1.bf16.msra.mxu1 %v1642_v31  ;;  %v49_v20 = vrot.slane %v44_v18, %v2136_v17  ;;  %v53_v21 = vrot.slane %v44_v18, %v2142_v19  ;;  %v1673_v31 = vld [vmem:[%s2440_s5 + $0x8] ss:$28 sps:$4 sm:$0xff]  }
  0x1f   :  { %151 = vmatpush1.bf16.msra.mxu0 %v1621_v25  ;;  %399 = vmatprep.subr.bf16.mxu1 %v1643_v32 }
  0x20   :  { %1171 = vmatprep.subr.bf16.mxu0 %v1672_v51  ;;  %v1735_v51 = vld [vmem:[%s2440_s5 + $0x23c] ss:$28 sps:$4 sm:$0xff]  }
  0x22   :  { %169 = vmatmul.mubr.bf16.vlgmr.msra.gmra.mrb[0].mxu0 %v27_v29  ;;  %400 = vmatpush1.bf16.msra.mxu1 %v1645_v33  ;;  %v1681_v33 = vld [vmem:[%s2440_s5 + $0x44] ss:$28 sps:$4 sm:$0xff]  }
  0x23   :  { %401 = vmatprep.subr.bf16.mxu1 %v1646_v34  ;;  %1172 = vmatpush1.bf16.msra.mxu0 %v1670_v50  ;;  %v1679_v34 = vld [vmem:[%s2440_s5 + $0x40] ss:$28 sps:$4 sm:$0xff]  }
  0x24   :  { %1173 = vmatprep.subr.bf16.mxu0 %v1678_v53  ;;  %v1727_v50 = vld [vmem:[%s2440_s5 + $0x200] ss:$28 sps:$4 sm:$0xff]   ;;  %v1741_v53 = vld [vmem:[%s2440_s5 + $0x274] ss:$28 sps:$4 sm:$0xff]  }
  0x26   :  { %402 = vmatpush1.bf16.msra.mxu1 %v1648_v35  ;;  %v1687_v35 = vld [vmem:[%s2440_s5 + $0x7c] ss:$28 sps:$4 sm:$0xff]  }
  0x27   :  { %403 = vmatprep.subr.bf16.mxu1 %v1649_v36  ;;  %1174 = vmatpush1.bf16.msra.mxu0 %v1676_v54  ;;  %v1685_v36 = vld [vmem:[%s2440_s5 + $0x78] ss:$28 sps:$4 sm:$0xff]   ;;  %v1739_v54 = vld [vmem:[%s2440_s5 + $0x270] ss:$28 sps:$4 sm:$0xff]  }
  0x28   :  { %1175 = vmatprep.subr.bf16.mxu0 %v1684_v55  ;;  %v1747_v55 = vld [vmem:[%s2440_s5 + $0x2ac] ss:$28 sps:$4 sm:$0xff]  }
  0x2a   :  { %404 = vmatpush1.bf16.msra.mxu1 %v1651_v37  ;;  %v1693_v37 = vld [vmem:[%s2440_s5 + $0xb4] ss:$28 sps:$4 sm:$0xff]  }
  0x2b   :  { %405 = vmatprep.subr.bf16.mxu1 %v1652_v38  ;;  %1176 = vmatpush1.bf16.msra.mxu0 %v1682_v56  ;;  %v1691_v38 = vld [vmem:[%s2440_s5 + $0xb0] ss:$28 sps:$4 sm:$0xff]   ;;  %v1745_v56 = vld [vmem:[%s2440_s5 + $0x2a8] ss:$28 sps:$4 sm:$0xff]  }
  0x2c   :  { %1177 = vmatprep.subr.bf16.mxu0 %v1690_v57  ;;  %v1753_v57 = vld [vmem:[%s2440_s5 + $0x2e4] ss:$28 sps:$4 sm:$0xff]  }
  0x2e   :  { %406 = vmatpush1.bf16.msra.mxu1 %v1654_v39  ;;  %v1699_v39 = vld [vmem:[%s2440_s5 + $0xec] ss:$28 sps:$4 sm:$0xff]  }
  0x2f   :  { %407 = vmatprep.subr.bf16.mxu1 %v1655_v40  ;;  %1178 = vmatpush1.bf16.msra.mxu0 %v1688_v58  ;;  %v1697_v40 = vld [vmem:[%s2440_s5 + $0xe8] ss:$28 sps:$4 sm:$0xff]   ;;  %v1751_v58 = vld [vmem:[%s2440_s5 + $0x2e0] ss:$28 sps:$4 sm:$0xff]  }
  0x30   :  { %1179 = vmatprep.subr.bf16.mxu0 %v1696_v59  ;;  %v1756_v59 = vld [vmem:[%s2440_s5 + $0x314] ss:$28 sps:$4 sm:$0xff]  }
  0x32   :  { %408 = vmatpush1.bf16.msra.mxu1 %v1657_v41  ;;  %v1705_v41 = vld [vmem:[%s2440_s5 + $0x124] ss:$28 sps:$4 sm:$0xff]  }
  0x33   :  { %409 = vmatprep.subr.bf16.mxu1 %v1658_v42  ;;  %1180 = vmatpush1.bf16.msra.mxu0 %v1694_v60  ;;  %v1703_v42 = vld [vmem:[%s2440_s5 + $0x120] ss:$28 sps:$4 sm:$0xff]  }
  0x34   :  { %1181 = vmatprep.subr.bf16.mxu0 %v1702_v61  ;;  %v1759_v60 = vld [vmem:[%s2440_s5 + $0x31c] ss:$28 sps:$4 sm:$0xff]   ;;  %v1754_v61 = vld [vmem:[%s2440_s5 + $0x310] ss:$28 sps:$4 sm:$0xff]  }
  0x36   :  { %410 = vmatpush1.bf16.msra.mxu1 %v1660_v43  ;;  %v1711_v43 = vld [vmem:[%s2440_s5 + $0x15c] ss:$28 sps:$4 sm:$0xff]  }
  0x37   :  { %411 = vmatprep.subr.bf16.mxu1 %v1661_v44  ;;  %1182 = vmatpush1.bf16.msra.mxu0 %v1700_v62  ;;  %v1709_v44 = vld [vmem:[%s2440_s5 + $0x158] ss:$28 sps:$4 sm:$0xff]  }
  0x38   :  { %1183 = vmatprep.subr.bf16.mxu0 %v1708_v63  ;;  %v1757_v62 = vld [vmem:[%s2440_s5 + $0x318] ss:$28 sps:$4 sm:$0xff]   ;;  %v1762_v63 = vld [vmem:[%s2440_s5 + $0x34c] ss:$28 sps:$4 sm:$0xff]  }
  0x3a   :  { %412 = vmatpush1.bf16.msra.mxu1 %v1663_v45  ;;  %v1717_v45 = vld [vmem:[%s2440_s5 + $0x194] ss:$28 sps:$4 sm:$0xff]  }
  0x3b   :  { %413 = vmatprep.subr.bf16.mxu1 %v1664_v46  ;;  %1184 = vmatpush1.bf16.msra.mxu0 %v1706_v0  ;;  %v1715_v46 = vld [vmem:[%s2440_s5 + $0x190] ss:$28 sps:$4 sm:$0xff]  }
  0x3c   :  { %1185 = vmatprep.subr.bf16.mxu0 %v1714_v1  ;;  %v1765_v0 = vld [vmem:[%s2440_s5 + $0x354] ss:$28 sps:$4 sm:$0xff]   ;;  %v1760_v1 = vld [vmem:[%s2440_s5 + $0x348] ss:$28 sps:$4 sm:$0xff]  }
  0x3e   :  { %414 = vmatpush1.bf16.msra.mxu1 %v1666_v47  ;;  %v1723_v47 = vld [vmem:[%s2440_s5 + $0x1cc] ss:$28 sps:$4 sm:$0xff]  }
  0x3f   :  { %415 = vmatprep.subr.bf16.mxu1 %v1667_v48  ;;  %1186 = vmatpush1.bf16.msra.mxu0 %v1712_v2  ;;  %v1721_v48 = vld [vmem:[%s2440_s5 + $0x1c8] ss:$28 sps:$4 sm:$0xff]   ;;  %v1763_v2 = vld [vmem:[%s2440_s5 + $0x350] ss:$28 sps:$4 sm:$0xff]  }
  0x40   :  { %1187 = vmatprep.subr.bf16.mxu0 %v1720_v3  ;;  %v1768_v3 = vld [vmem:[%s2440_s5 + $0x14] ss:$28 sps:$4 sm:$0xff]  }
  0x42   :  { %416 = vmatpush1.bf16.msra.mxu1 %v1669_v49  ;;  %v1729_v49 = vld [vmem:[%s2440_s5 + $0x204] ss:$28 sps:$4 sm:$0xff]  }
  0x43   :  { %1212 = vmatprep.subr.bf16.mxu1 %v1675_v52  ;;  %1188 = vmatpush1.bf16.msra.mxu0 %v1718_v4  ;;  %v1733_v52 = vld [vmem:[%s2440_s5 + $0x238] ss:$28 sps:$4 sm:$0xff]  }
  0x44   :  { %1189 = vmatprep.subr.bf16.mxu0 %v1726_v5  ;;  %v1769_v4 = vld [vmem:[%s2440_s5 + $0x1d8] ss:$28 sps:$4 sm:$0xff]   ;;  %v213_v5 = vld [vmem:[%s2442_s4] sm:$0x3] }
  0x47   :  { %1190 = vmatpush1.bf16.msra.mxu0 %v1724_v6  ;;  %v218_v6 = vrot.slane %v213_v5, %v2136_v17 }
  0x48   :  { %1191 = vmatprep.subr.bf16.mxu0 %v1732_v7  ;;  %v222_v7 = vrot.slane %v213_v5, %v2142_v19  ;;  %v574_v5 = vsub.s32 3, %v2133_v16 }
  0x4b   :  { %1192 = vmatpush1.bf16.msra.mxu0 %v1730_v8 }
  0x4c   :  { %1193 = vmatprep.subr.bf16.mxu0 %v1738_v9 }
  0x4f   :  { %1194 = vmatpush1.bf16.msra.mxu0 %v1736_v10 }
  0x50   :  { %1195 = vmatprep.subr.bf16.mxu0 %v1744_v11 }
  0x53   :  { %1196 = vmatpush1.bf16.msra.mxu0 %v1742_v12 }
  0x54   :  { %1197 = vmatprep.subr.bf16.mxu0 %v1750_v13 }
  0x57   :  { %1198 = vmatpush1.bf16.msra.mxu0 %v1748_v14 }
  0x58   :  { %1199 = vmatprep.subr.bf16.mxu0 %v1756_v59  ;;  %v1820_v59 = vld [vmem:[%s2440_s5 + $0x2b4] ss:$28 sps:$4 sm:$0xff]  }
  0x5b   :  { %1200 = vmatpush1.bf16.msra.mxu0 %v1754_v61  ;;  %v1823_v61 = vld [vmem:[%s2440_s5 + $0x2ec] ss:$28 sps:$4 sm:$0xff]  }
  0x5c   :  { %1201 = vmatprep.subr.bf16.mxu0 %v1762_v63  ;;  %v1826_v63 = vld [vmem:[%s2440_s5 + $0x324] ss:$28 sps:$4 sm:$0xff]  }
  0x5f   :  { %1202 = vmatpush1.bf16.msra.mxu0 %v1760_v1  ;;  %v1829_v1 = vld [vmem:[%s2440_s5 + $0x35c] ss:$28 sps:$4 sm:$0xff]  }
  0x60   :  { %1253 = vmatprep.subr.bf16.mxu0 %v1768_v3  ;;  %v570_v3 = vsub.s32 2, %v2133_v16 }
  0xf5   :  { %v170_v22 = vpop.f32.mrb[0].mxu0 }
  0xf6   :  { %v171_v23 = vadd.f32 %v170_v22, %v49_v20  ;;  %v172_v24 = vpop.f32.mrb[1].mxu0  ;;  %v1766_v20 = vld [vmem:[%s2440_s5 + $0x10] ss:$28 sps:$4 sm:$0xff]  }
  0xf7   :  { %v173_v25 = vadd.f32 %v172_v24, %v53_v21  ;;  %v174_v26 = vpop.f32.mrb[2].mxu0  ;;  %v1770_v21 = vld [vmem:[%s2440_s5 + $0x18] ss:$28 sps:$4 sm:$0xff]   ;;  %v1774_v24 = vld [vmem:[%s2440_s5 + $0x210] ss:$28 sps:$4 sm:$0xff]  }
  0xf8   :  { %v177_v27 = vmax.f32 %v171_v23, 0.0  ;;  %v175_v28 = vpop.f32.mrb[3].mxu0  ;;  %v1773_v23 = vld [vmem:[%s2440_s5 + $0x4c] ss:$28 sps:$4 sm:$0xff]  }
  0xf9   :  { %v178_v29 = vmax.f32 %v173_v25, 0.0  ;;  %v1771_v25 = vld [vmem:[%s2440_s5 + $0x48] ss:$28 sps:$4 sm:$0xff]   ;;  %v1775_v26 = vld [vmem:[%s2440_s5 + $0x50] ss:$28 sps:$4 sm:$0xff]  }
  0xfa   :  { %v179_v32 = vpack.c.bf16 %v177_v27, %v177_v27  ;;  %v1778_v27 = vld [vmem:[%s2440_s5 + $0x84] ss:$28 sps:$4 sm:$0xff]  }
  0xfb   :  { %v180_v30 = vpack.c.bf16 %v178_v29, %v178_v29  ;;  %v1779_v28 = vld [vmem:[%s2440_s5 + $0x248] ss:$28 sps:$4 sm:$0xff]   ;;  %v1776_v29 = vld [vmem:[%s2440_s5 + $0x80] ss:$28 sps:$4 sm:$0xff]  }
  0xfd   :  { %417 = vmatprep.mubr.bf16.mxu1 %v180_v30  ;;  %v1780_v30 = vld [vmem:[%s2440_s5 + $0x88] ss:$28 sps:$4 sm:$0xff]  }
  0xfe   :  { %418 = vmatmul.mubr.bf16.vlgmr.msra.gmra.mrb[0].mxu1 %v179_v32  ;;  %v1784_v32 = vld [vmem:[%s2440_s5 + $0x280] ss:$28 sps:$4 sm:$0xff]  }
  0xff   :  { %1213 = vmatpush1.bf16.msra.mxu1 %v1673_v31  ;;  %v1783_v31 = vld [vmem:[%s2440_s5 + $0xbc] ss:$28 sps:$4 sm:$0xff]  }
 0x100   :  { %1214 = vmatprep.subr.bf16.mxu1 %v1681_v33  ;;  %v1781_v33 = vld [vmem:[%s2440_s5 + $0xb8] ss:$28 sps:$4 sm:$0xff]  }
 0x103   :  { %1215 = vmatpush1.bf16.msra.mxu1 %v1679_v34  ;;  %v1785_v34 = vld [vmem:[%s2440_s5 + $0xc0] ss:$28 sps:$4 sm:$0xff]  }
 0x104   :  { %1216 = vmatprep.subr.bf16.mxu1 %v1687_v35  ;;  %v1788_v35 = vld [vmem:[%s2440_s5 + $0xf4] ss:$28 sps:$4 sm:$0xff]  }
 0x107   :  { %1217 = vmatpush1.bf16.msra.mxu1 %v1685_v36  ;;  %v1789_v36 = vld [vmem:[%s2440_s5 + $0x2b8] ss:$28 sps:$4 sm:$0xff]  }
 0x108   :  { %1218 = vmatprep.subr.bf16.mxu1 %v1693_v37  ;;  %v1786_v37 = vld [vmem:[%s2440_s5 + $0xf0] ss:$28 sps:$4 sm:$0xff]  }
 0x10b   :  { %1219 = vmatpush1.bf16.msra.mxu1 %v1691_v38  ;;  %v1790_v38 = vld [vmem:[%s2440_s5 + $0xf8] ss:$28 sps:$4 sm:$0xff]  }
 0x10c   :  { %1220 = vmatprep.subr.bf16.mxu1 %v1699_v39  ;;  %v1793_v39 = vld [vmem:[%s2440_s5 + $0x12c] ss:$28 sps:$4 sm:$0xff]  }
 0x10f   :  { %1221 = vmatpush1.bf16.msra.mxu1 %v1697_v40  ;;  %v1794_v40 = vld [vmem:[%s2440_s5 + $0x2f0] ss:$28 sps:$4 sm:$0xff]  }
 0x110   :  { %1222 = vmatprep.subr.bf16.mxu1 %v1705_v41  ;;  %v1791_v41 = vld [vmem:[%s2440_s5 + $0x128] ss:$28 sps:$4 sm:$0xff]  }
 0x113   :  { %1223 = vmatpush1.bf16.msra.mxu1 %v1703_v42  ;;  %v1795_v42 = vld [vmem:[%s2440_s5 + $0x130] ss:$28 sps:$4 sm:$0xff]  }
 0x114   :  { %1224 = vmatprep.subr.bf16.mxu1 %v1711_v43  ;;  %v1798_v43 = vld [vmem:[%s2440_s5 + $0x164] ss:$28 sps:$4 sm:$0xff]  }
 0x117   :  { %1225 = vmatpush1.bf16.msra.mxu1 %v1709_v44  ;;  %v1799_v44 = vld [vmem:[%s2440_s5 + $0x328] ss:$28 sps:$4 sm:$0xff]  }
 0x118   :  { %1226 = vmatprep.subr.bf16.mxu1 %v1717_v45  ;;  %v1796_v45 = vld [vmem:[%s2440_s5 + $0x160] ss:$28 sps:$4 sm:$0xff]  }
 0x11b   :  { %1227 = vmatpush1.bf16.msra.mxu1 %v1715_v46  ;;  %v1800_v46 = vld [vmem:[%s2440_s5 + $0x168] ss:$28 sps:$4 sm:$0xff]  }
 0x11c   :  { %1228 = vmatprep.subr.bf16.mxu1 %v1723_v47  ;;  %v1803_v47 = vld [vmem:[%s2440_s5 + $0x19c] ss:$28 sps:$4 sm:$0xff]  }
 0x11f   :  { %1229 = vmatpush1.bf16.msra.mxu1 %v1721_v48  ;;  %v1804_v48 = vld [vmem:[%s2440_s5 + $0x360] ss:$28 sps:$4 sm:$0xff]  }
 0x120   :  { %1230 = vmatprep.subr.bf16.mxu1 %v1729_v49  ;;  %v1801_v49 = vld [vmem:[%s2440_s5 + $0x198] ss:$28 sps:$4 sm:$0xff]  }
 0x123   :  { %1231 = vmatpush1.bf16.msra.mxu1 %v1727_v50  ;;  %v1805_v50 = vld [vmem:[%s2440_s5 + $0x1a0] ss:$28 sps:$4 sm:$0xff]  }
 0x124   :  { %1232 = vmatprep.subr.bf16.mxu1 %v1735_v51  ;;  %v1808_v51 = vld [vmem:[%s2440_s5 + $0x1d4] ss:$28 sps:$4 sm:$0xff]  }
 0x127   :  { %1233 = vmatpush1.bf16.msra.mxu1 %v1733_v52  ;;  %v1806_v52 = vld [vmem:[%s2440_s5 + $0x1d0] ss:$28 sps:$4 sm:$0xff]  }
 0x128   :  { %1234 = vmatprep.subr.bf16.mxu1 %v1741_v53  ;;  %v1811_v53 = vld [vmem:[%s2440_s5 + $0x20c] ss:$28 sps:$4 sm:$0xff]  }
 0x12b   :  { %1235 = vmatpush1.bf16.msra.mxu1 %v1739_v54  ;;  %v1809_v54 = vld [vmem:[%s2440_s5 + $0x208] ss:$28 sps:$4 sm:$0xff]  }
 0x12c   :  { %1236 = vmatprep.subr.bf16.mxu1 %v1747_v55  ;;  %v1814_v55 = vld [vmem:[%s2440_s5 + $0x244] ss:$28 sps:$4 sm:$0xff]  }
 0x12f   :  { %1237 = vmatpush1.bf16.msra.mxu1 %v1745_v56  ;;  %v1812_v56 = vld [vmem:[%s2440_s5 + $0x240] ss:$28 sps:$4 sm:$0xff]  }
 0x130   :  { %1238 = vmatprep.subr.bf16.mxu1 %v1753_v57  ;;  %v1817_v57 = vld [vmem:[%s2440_s5 + $0x27c] ss:$28 sps:$4 sm:$0xff]  }
 0x133   :  { %1239 = vmatpush1.bf16.msra.mxu1 %v1751_v58  ;;  %v1815_v58 = vld [vmem:[%s2440_s5 + $0x278] ss:$28 sps:$4 sm:$0xff]  }
 0x134   :  { %1240 = vmatprep.subr.bf16.mxu1 %v1759_v60  ;;  %v1818_v60 = vld [vmem:[%s2440_s5 + $0x2b0] ss:$28 sps:$4 sm:$0xff]  }
 0x137   :  { %1241 = vmatpush1.bf16.msra.mxu1 %v1757_v62  ;;  %v1821_v62 = vld [vmem:[%s2440_s5 + $0x2e8] ss:$28 sps:$4 sm:$0xff]  }
 0x138   :  { %1242 = vmatprep.subr.bf16.mxu1 %v1765_v0  ;;  %v1824_v0 = vld [vmem:[%s2440_s5 + $0x320] ss:$28 sps:$4 sm:$0xff]  }
 0x13b   :  { %1243 = vmatpush1.bf16.msra.mxu1 %v1763_v2  ;;  %v1827_v2 = vld [vmem:[%s2440_s5 + $0x358] ss:$28 sps:$4 sm:$0xff]  }
 0x13c   :  { %1575 = vmatprep.subr.bf16.mxu1 %v1769_v4  ;;  %v2410_v4 = vld [vmem:[%s2443_s6] sm:$0x7f] }
 0x1d1   :  { %v419_v8 = vpop.f32.mrb[0].mxu1 }
 0x1d2   :  { %v420_v9 = vadd.f32 %v419_v8, %v218_v6  ;;  %v421_v10 = vpop.f32.mrb[1].mxu1  ;;  %v563_v6 = vrot.slane %v2410_v4, %v2136_v17  ;;  %v567_v8 = vrot.slane %v2410_v4, %v2142_v19 }
 0x1d3   :  { %v422_v11 = vadd.f32 %v421_v10, %v222_v7  ;;  %v423_v12 = vpop.f32.mrb[2].mxu1  ;;  %v571_v7 = vrot.slane %v2410_v4, %v570_v3 }
 0x1d4   :  { %v426_v13 = vmax.f32 %v420_v9, 0.0  ;;  %v424_v14 = vpop.f32.mrb[3].mxu1  ;;  %v575_v9 = vrot.slane %v2410_v4, %v574_v5 }
 0x1d5   :  { %v427_v15 = vmax.f32 %v422_v11, 0.0 }
 0x1d6   :  { %v2268_v22 = vpack.c.bf16 %v426_v13, %v426_v13 }
 0x1d7   :  { %v429_v18 = vpack.c.bf16 %v427_v15, %v427_v15 }
 0x1d9   :  { %1203 = vmatprep.mubr.bf16.mxu0 %v429_v18  ;;  %1244 = vmatprep.mubr.bf16.mxu1 %v429_v18 }
 0x1da   :  { %1204 = vmatmul.mubr.bf16.vlgmr.msra.gmra.mrb[4].mxu0 %v2268_v22  ;;  %1245 = vmatmul.mubr.bf16.vlgmr.msra.gmra.mrb[4].mxu1 %v2268_v22 }
 0x1db   :  { %1254 = vmatpush1.bf16.msra.mxu0 %v1766_v20  ;;  %1576 = vmatpush3.bf16.msra.mxu1 %v1770_v21 }
 0x1dc   :  { %1285 = vmatprep.mubr.bf16.mxu0 %v429_v18  ;;  %1326 = vmatprep.mubr.bf16.mxu1 %v429_v18 }
 0x1dd   :  { %1255 = vmatprep.subr.bf16.mxu0 %v1773_v23  ;;  %1577 = vmatprep.subr.bf16.mxu1 %v1774_v24 }
 0x1df   :  { %1256 = vmatpush1.bf16.msra.mxu0 %v1771_v25  ;;  %1578 = vmatpush3.bf16.msra.mxu1 %v1775_v26 }
 0x1e0   :  { %1257 = vmatprep.subr.bf16.mxu0 %v1778_v27  ;;  %1579 = vmatprep.subr.bf16.mxu1 %v1779_v28 }
 0x1e3   :  { %1258 = vmatpush1.bf16.msra.mxu0 %v1776_v29  ;;  %1580 = vmatpush3.bf16.msra.mxu1 %v1780_v30 }
 0x1e4   :  { %1259 = vmatprep.subr.bf16.mxu0 %v1783_v31  ;;  %1581 = vmatprep.subr.bf16.mxu1 %v1784_v32 }
 0x1e7   :  { %1260 = vmatpush1.bf16.msra.mxu0 %v1781_v33  ;;  %1582 = vmatpush3.bf16.msra.mxu1 %v1785_v34 }
 0x1e8   :  { %1261 = vmatprep.subr.bf16.mxu0 %v1788_v35  ;;  %1583 = vmatprep.subr.bf16.mxu1 %v1789_v36 }
 0x1eb   :  { %1262 = vmatpush1.bf16.msra.mxu0 %v1786_v37  ;;  %1584 = vmatpush3.bf16.msra.mxu1 %v1790_v38 }
 0x1ec   :  { %1263 = vmatprep.subr.bf16.mxu0 %v1793_v39  ;;  %1585 = vmatprep.subr.bf16.mxu1 %v1794_v40  ;;  %v586_v39 = vsub.s32 6, %v2133_v16 }
 0x1ef   :  { %1264 = vmatpush1.bf16.msra.mxu0 %v1791_v41  ;;  %1586 = vmatpush3.bf16.msra.mxu1 %v1795_v42 }
 0x1f0   :  { %1265 = vmatprep.subr.bf16.mxu0 %v1798_v43  ;;  %1587 = vmatprep.subr.bf16.mxu1 %v1799_v44  ;;  %v587_v44 = vrot.slane %v2410_v4, %v586_v39 }
 0x1f3   :  { %1266 = vmatpush1.bf16.msra.mxu0 %v1796_v45  ;;  %1588 = vmatpush3.bf16.msra.mxu1 %v1800_v46 }
 0x1f4   :  { %1267 = vmatprep.subr.bf16.mxu0 %v1803_v47  ;;  %1589 = vmatprep.subr.bf16.mxu1 %v1804_v48 }
 0x1f7   :  { %1268 = vmatpush1.bf16.msra.mxu0 %v1801_v49  ;;  %1590 = vmatpush3.bf16.msra.mxu1 %v1805_v50 }
 0x1f8   :  { %1269 = vmatprep.subr.bf16.mxu0 %v1808_v51 }
 0x1fa   :  { %1327 = vmatmul.mubr.bf16.vlgmr.msra.gmra.mrb[8].mxu1 %v2268_v22 }
 0x1fb   :  { %1270 = vmatpush1.bf16.msra.mxu0 %v1806_v52 }
 0x1fc   :  { %1271 = vmatprep.subr.bf16.mxu0 %v1811_v53 }
 0x1ff   :  { %1272 = vmatpush1.bf16.msra.mxu0 %v1809_v54 }
 0x200   :  { %1273 = vmatprep.subr.bf16.mxu0 %v1814_v55 }
 0x203   :  { %1274 = vmatpush1.bf16.msra.mxu0 %v1812_v56 }
 0x204   :  { %1275 = vmatprep.subr.bf16.mxu0 %v1817_v57  ;;  %v578_v57 = vsub.s32 4, %v2133_v16 }
 0x207   :  { %1276 = vmatpush1.bf16.msra.mxu0 %v1815_v58  ;;  %v582_v58 = vsub.s32 5, %v2133_v16 }
 0x208   :  { %1277 = vmatprep.subr.bf16.mxu0 %v1820_v59  ;;  %v579_v59 = vrot.slane %v2410_v4, %v578_v57 }
 0x20b   :  { %1278 = vmatpush1.bf16.msra.mxu0 %v1818_v60  ;;  %v583_v60 = vrot.slane %v2410_v4, %v582_v58 }
 0x20c   :  { %1279 = vmatprep.subr.bf16.mxu0 %v1823_v61 }
 0x20f   :  { %1280 = vmatpush1.bf16.msra.mxu0 %v1821_v62 }
 0x210   :  { %1281 = vmatprep.subr.bf16.mxu0 %v1826_v63 }
 0x213   :  { %1282 = vmatpush1.bf16.msra.mxu0 %v1824_v0 }
 0x214   :  { %1283 = vmatprep.subr.bf16.mxu0 %v1829_v1 }
 0x217   :  { %1284 = vmatpush1.bf16.msra.mxu0 %v1827_v2 }
 0x21a   :  { %1286 = vmatmul.mubr.bf16.vlgmr.msra.gmra.mrb[8].mxu0 %v2268_v22 }
 0x2ad   :  { %v1205_v10 = vpop.f32.mrb[4].mxu0  ;;  %v1246_v11 = vpop.f32.mrb[4].mxu1 }
 0x2ae   :  { %v1206_v12 = vadd.f32 %v1205_v10, %v563_v6  ;;  %v1247_v13 = vadd.f32 %v1246_v11, %v571_v7  ;;  %v1207_v14 = vpop.f32.mrb[5].mxu0  ;;  %v1248_v15 = vpop.f32.mrb[5].mxu1 }
 0x2af   :  { %v1208_v18 = vadd.f32 %v1207_v14, %v567_v8  ;;  %v1249_v20 = vadd.f32 %v1248_v15, %v575_v9  ;;  %v1209_v21 = vpop.f32.mrb[6].mxu0  ;;  %v1250_v22 = vpop.f32.mrb[6].mxu1 }
 0x2b0   :  { %v1334_v23 = vsub.f32 0.0, %v1206_v12  ;;  %v1336_v24 = vsub.f32 0.0, %v1247_v13  ;;  %v1210_v17 = vpop.f32.mrb[7].mxu0  ;;  %v1251_v25 = vpop.f32.mrb[7].mxu1 }
 0x2b1   :  { %v1335_v26 = vsub.f32 0.0, %v1208_v18  ;;  %v1337_v27 = vsub.f32 0.0, %v1249_v20 }
 0x2b2   :  { %v1341_v28 = vmul.f32 1.442695, %v1334_v23  ;;  %v1345_v19 = vmul.f32 1.442695, %v1336_v24 }
 0x2b3   :  { %v1343_v29 = vmul.f32 1.442695, %v1335_v26  ;;  %v1347_v30 = vmul.f32 1.442695, %v1337_v27 }
 0x2b4   :  { %1830 = vpow2.f32 %v1341_v28 }
 0x2b5   :  { %1832 = vpow2.f32 %v1345_v19 }
 0x2b6   :  { %1834 = vpow2.f32 %v1343_v29 }
 0x2b7   :  { %1836 = vpow2.f32 %v1347_v30 }
 0x2be   :  { %v1831_v31 = vpop.eup %1830 }
 0x2bf   :  { %v1833_v32 = vpop.eup %1832  ;;  %v1355_v33 = vadd.f32 1.0, %v1831_v31 }
 0x2c0   :  { %v1835_v34 = vpop.eup %1834  ;;  %v1357_v35 = vadd.f32 1.0, %v1833_v32 }
 0x2c1   :  { %v1837_v36 = vpop.eup %1836  ;;  %1838 = vrcp.f32 %v1355_v33  ;;  %v1356_v37 = vadd.f32 1.0, %v1835_v34 }
 0x2c2   :  { %1840 = vrcp.f32 %v1357_v35  ;;  %v1358_v38 = vadd.f32 1.0, %v1837_v36 }
 0x2c3   :  { %1842 = vrcp.f32 %v1356_v37 }
 0x2c4   :  { %1844 = vrcp.f32 %v1358_v38 }
 0x2cb   :  { %v1839_v40 = vpop.eup %1838 }
 0x2cc   :  { %v1841_v41 = vpop.eup %1840 }
 0x2cd   :  { %v1843_v42 = vpop.eup %1842  ;;  %v1591_v43 = vpop.f32.mrb[8].mxu1 }
 0x2ce   :  { %v1845_v45 = vpop.eup %1844  ;;  %v1571_v46 = vpack.c.bf16 %v1843_v42, %v1839_v40  ;;  %v1592_v47 = vpop.f32.mrb[9].mxu1 }
 0x2cf   :  { %v1572_v48 = vpack.c.bf16 %v1845_v45, %v1841_v41  ;;  %v1593_v49 = vadd.f32 %v1592_v47, %v1591_v43  ;;  %v1594_v50 = vpop.f32.mrb[10].mxu1 }
 0x2d0   :  { %1398 = vst [vmem:[%s2444_s7] sm:$0xff] %v1571_v46  ;;  %v1595_v51 = vpop.f32.mrb[11].mxu1 }
 0x2d1   :  { %1399 = vst [vmem:[%s2444_s7 + $0x8] sm:$0xff] %v1572_v48  ;;  %v1329_v52 = vadd.f32 %v1593_v49, %v587_v44 }
 0x2d3   :  { %v1340_v53 = vsub.f32 0.0, %v1329_v52 }
 0x2d5   :  { %v1353_v54 = vmul.f32 1.442695, %v1340_v53 }
 0x2d7   :  { %1846 = vpow2.f32 %v1353_v54 }
 0x2e1   :  { %v1847_v55 = vpop.eup %1846 }
 0x2e2   :  { %v1361_v56 = vadd.f32 1.0, %v1847_v55 }
 0x2e4   :  { %1848 = vrcp.f32 %v1361_v56 }
 0x2ed   :  { %v1287_v61 = vpop.f32.mrb[8].mxu0 }
 0x2ee   :  { %v1849_v62 = vpop.eup %1848  ;;  %v1288_v63 = vadd.f32 %v1287_v61, %v579_v59  ;;  %v1289_v0 = vpop.f32.mrb[9].mxu0 }
 0x2ef   :  { %v1574_v1 = vpack.c.bf16 %v1849_v62, %v1849_v62  ;;  %v1290_v2 = vadd.f32 %v1289_v0, %v583_v60  ;;  %v1291_v3 = vpop.f32.mrb[10].mxu0 }
 0x2f0   :  { %v1338_v5 = vsub.f32 0.0, %v1288_v63  ;;  %v1292_v6 = vpop.f32.mrb[11].mxu0 }
 0x2f1   :  { %1402 = vst.msk [vmem:[%s2444_s7 + $0x18] sm:$0xf] %vm1401_vm0, %v1574_v1  ;;  %v1339_v7 = vsub.f32 0.0, %v1290_v2 }
 0x2f2   :  { %v1349_v16 = vmul.f32 1.442695, %v1338_v5 }
 0x2f3   :  { %v1351_v8 = vmul.f32 1.442695, %v1339_v7 }
 0x2f4   :  { %1850 = vpow2.f32 %v1349_v16 }
 0x2f5   :  { %1852 = vpow2.f32 %v1351_v8 }
 0x2fe   :  { %v1851_v4 = vpop.eup %1850 }
 0x2ff   :  { %v1853_v9 = vpop.eup %1852  ;;  %v1359_v10 = vadd.f32 1.0, %v1851_v4 }
 0x300   :  { %v1360_v11 = vadd.f32 1.0, %v1853_v9 }
 0x301   :  { %1854 = vrcp.f32 %v1359_v10 }
 0x302   :  { %1856 = vrcp.f32 %v1360_v11 }
 0x30b   :  { %v1855_v12 = vpop.eup %1854 }
 0x30c   :  { %v1857_v13 = vpop.eup %1856 }
 0x30d   :  { %v1573_v14 = vpack.c.bf16 %v1857_v13, %v1855_v12 }
 0x30f   :  { %1400 = vst [vmem:[%s2444_s7 + $0x10] sm:$0xff] %v1573_v14 }

</bundles_post_ra>
